<compile_context>
chip_gen: v5e
topology: v5e:2x2
jax: 0.10.0
libtpu: 0.0.40
codegen_flags: <defaults>
</compile_context>

<pallas_src>
import numpy as np
import jax
import jax.numpy as jnp
from jax import lax
from jax.experimental import pallas as pl
from jax.experimental.pallas import tpu as pltpu

EPS = 1e-5


# ----------------------- host-side helper matrices (glue) -------------------

def _pool_matrix(in_size, out_size):
    # PyTorch AdaptiveAvgPool bin semantics: start=floor(i*n/s), end=ceil((i+1)*n/s)
    P = np.zeros((out_size, in_size), dtype=np.float32)
    for i in range(out_size):
        start = (i * in_size) // out_size
        end = -(-((i + 1) * in_size) // out_size)  # ceil
        P[i, start:end] = 1.0 / (end - start)
    return P


def _upsample_matrix(in_size, out_size):
    # bilinear, align_corners=True (F.upsample semantics)
    A = np.zeros((out_size, in_size), dtype=np.float32)
    if in_size == 1:
        A[:, 0] = 1.0
        return A
    for h in range(out_size):
        src = h * (in_size - 1) / (out_size - 1) if out_size > 1 else 0.0
        y0 = min(int(np.floor(src)), in_size - 1)
        y1 = min(y0 + 1, in_size - 1)
        w = src - y0
        A[h, y0] += 1.0 - w
        A[h, y1] += w
    return A


# ------------------------------- wrapper --------------------------------------

def psp_forward(x, params, sizes=(1, 2, 3, 6), compute_dtype=jnp.float32):
    N, C_in, H, W = x.shape
    S = len(sizes)
    C_out = params["w1"].shape[1]
    P = H * W                       # 256 here -> lane-dense stores
    SS = max(sizes) ** 2            # per-stage pooled pixels, padded uniform
    C_pr = S * C_out                # prior channels
    C_cat = C_pr + C_in
    assert params["w2"].shape[1] == C_cat
    MARGIN = ((W + 1 + 127) // 128) * 128   # lane-aligned halo >= W+1
    EXT = MARGIN + P + MARGIN
    cdt = compute_dtype

    # fold inference-mode BN of each stage into the 1x1 conv
    scale1 = params["gamma1"] / jnp.sqrt(params["var1"] + EPS)            # (S, C_out)
    w1s = (params["w1"] * scale1[:, :, None]).astype(cdt)                 # (S, C_out, C_in)
    shift1 = (params["beta1"] - params["mean1"] * scale1)[:, :, None]     # (S, C_out, 1) f32

    # separable adaptive-pool / bilinear-upsample operators, zero-padded to SS
    mt_np = np.zeros((S, P, SS), np.float32)   # x_flat @ mt[j] -> pooled (C, s^2)
    at_np = np.zeros((S, SS, P), np.float32)   # y @ at[j]      -> upsampled (C, P)
    for j, s in enumerate(sizes):
        M = np.kron(_pool_matrix(H, s), _pool_matrix(W, s))           # (s^2, P)
        A = np.kron(_upsample_matrix(s, H), _upsample_matrix(s, W))   # (P, s^2)
        mt_np[j, :, :s * s] = M.T
        at_np[j, :s * s, :] = A.T
    mt = jnp.asarray(mt_np, dtype=cdt)
    at = jnp.asarray(at_np, dtype=cdt)

    # fold inference-mode BN of the bottleneck into the 3x3 conv; split taps
    scale2 = params["gamma2"] / jnp.sqrt(params["var2"] + EPS)            # (C_out,)
    w2s = params["w2"] * scale2[:, None, None, None]                      # (C_out, C_cat, 3, 3)
    w2taps = jnp.transpose(w2s, (2, 3, 0, 1)).reshape(9, C_out, C_cat).astype(cdt)
    w2p = w2taps[:, :, :C_pr]                                             # (9, C_out, C_pr)
    w2x = w2taps[:, :, C_pr:]                                             # (9, C_out, C_in)
    shift2 = (params["beta2"] - params["mean2"] * scale2)[:, None]        # (C_out, 1) f32

    # per-tap validity masks (handle horizontal wrap of the flattened shift;
    # vertical out-of-bounds is handled by the zero margins, mask kept anyway)
    hh, ww = np.meshgrid(np.arange(H), np.arange(W), indexing="ij")
    masks_np = np.zeros((9, 1, P), np.float32)
    for k in range(9):
        dy, dx = k // 3 - 1, k % 3 - 1
        valid = (hh + dy >= 0) & (hh + dy < H) & (ww + dx >= 0) & (ww + dx < W)
        masks_np[k, 0] = valid.reshape(-1)
    masks = jnp.asarray(masks_np)

    x_flat = x.reshape(N, C_in, P).astype(cdt)

    # ---------------- kernel 1: all pyramid stages, one step per batch -------
    def stage_kernel(x_ref, mt_ref, at_ref, w1_ref, sh1_ref, pr_ref):
        xb = x_ref[0]                                                 # (C_in, P)
        for j in range(S):                                            # unrolled, tiny
            pooled = jnp.dot(xb, mt_ref[j],
                             preferred_element_type=jnp.float32).astype(cdt)
            y = jnp.dot(w1_ref[j], pooled,
                        preferred_element_type=jnp.float32).astype(cdt)
            pr = jnp.dot(y, at_ref[j],
                         preferred_element_type=jnp.float32) + sh1_ref[j]
            pr_ref[0, j * C_out:(j + 1) * C_out, :] = pr.astype(pr_ref.dtype)

    priors = pl.pallas_call(
        stage_kernel,
        out_shape=jax.ShapeDtypeStruct((N, C_pr, P), cdt),
        grid_spec=pltpu.PrefetchScalarGridSpec(
            num_scalar_prefetch=0,
            grid=(N,),
            in_specs=[
                pl.BlockSpec((1, C_in, P), lambda n: (n, 0, 0)),
                pl.BlockSpec((S, P, SS), lambda n: (0, 0, 0)),      # resident
                pl.BlockSpec((S, SS, P), lambda n: (0, 0, 0)),      # resident
                pl.BlockSpec((S, C_out, C_in), lambda n: (0, 0, 0)),
                pl.BlockSpec((S, C_out, 1), lambda n: (0, 0, 0)),
            ],
            out_specs=pl.BlockSpec((1, C_pr, P), lambda n: (n, 0, 0)),
        ),
        compiler_params=pltpu.CompilerParams(
            dimension_semantics=("parallel",)),
    )(x_flat, mt, at, w1s, shift1)

    # -------- kernel 2: 3x3 conv + BN + ReLU, concat fused (split contraction)
    def bottleneck_kernel(pr_ref, x_ref, w2p_ref, w2x_ref, sh2_ref, mask_ref,
                          o_ref, extp_ref, extx_ref):
        # zero-margined copies in VMEM so each tap is a static shifted slice
        extp_ref[...] = jnp.zeros_like(extp_ref)
        extx_ref[...] = jnp.zeros_like(extx_ref)
        extp_ref[:, MARGIN:MARGIN + P] = pr_ref[0]
        extx_ref[:, MARGIN:MARGIN + P] = x_ref[0]
        acc = jnp.zeros((C_out, P), jnp.float32)
        for k in range(9):                                            # unrolled taps
            dy, dx = k // 3 - 1, k % 3 - 1
            off = dy * W + dx
            sp = extp_ref[:, MARGIN + off:MARGIN + off + P]           # (C_pr, P)
            sx = extx_ref[:, MARGIN + off:MARGIN + off + P]           # (C_in, P)
            tap = (jnp.dot(w2p_ref[k], sp, preferred_element_type=jnp.float32)
                   + jnp.dot(w2x_ref[k], sx, preferred_element_type=jnp.float32))
            acc = acc + mask_ref[k] * tap
        o_ref[0] = jnp.maximum(acc + sh2_ref[...], 0.0)               # folded BN + ReLU

    out_flat = pl.pallas_call(
        bottleneck_kernel,
        out_shape=jax.ShapeDtypeStruct((N, C_out, P), jnp.float32),
        grid_spec=pltpu.PrefetchScalarGridSpec(
            num_scalar_prefetch=0,
            grid=(N,),
            in_specs=[
                pl.BlockSpec((1, C_pr, P), lambda n: (n, 0, 0)),
                pl.BlockSpec((1, C_in, P), lambda n: (n, 0, 0)),
                pl.BlockSpec((9, C_out, C_pr), lambda n: (0, 0, 0)),  # resident
                pl.BlockSpec((9, C_out, C_in), lambda n: (0, 0, 0)),
                pl.BlockSpec((C_out, 1), lambda n: (0, 0)),
                pl.BlockSpec((9, 1, P), lambda n: (0, 0, 0)),
            ],
            out_specs=pl.BlockSpec((1, C_out, P), lambda n: (n, 0, 0)),
            scratch_shapes=[pltpu.VMEM((C_pr, EXT), cdt),
                            pltpu.VMEM((C_in, EXT), cdt)],
        ),
        compiler_params=pltpu.CompilerParams(
            dimension_semantics=("parallel",)),
    )(priors, x_flat, w2p, w2x, shift2, masks)

    # TODO(synk): nn.Dropout2d(0.1) and BatchNorm batch-statistics are
    # training-mode only; inference semantics (identity dropout, running-stats
    # BN folded into the convs) are implemented here.
    return out_flat.reshape(N, C_out, H, W)


# ------------------------ pure-JAX reference (for self-check) ----------------

def ref_forward(x, params, sizes=(1, 2, 3, 6)):
    N, C_in, H, W = x.shape
    priors = []
    for j, s in enumerate(sizes):
        Ph = jnp.asarray(_pool_matrix(H, s))
        Pw = jnp.asarray(_pool_matrix(W, s))
        pooled = jnp.einsum('ih,nchw,jw->ncij', Ph, x, Pw)
        y = jnp.einsum('oc,ncij->noij', params["w1"][j], pooled)
        sc = params["gamma1"][j] / jnp.sqrt(params["var1"][j] + EPS)
        y = y * sc[None, :, None, None] + \
            (params["beta1"][j] - params["mean1"][j] * sc)[None, :, None, None]
        Ah = jnp.asarray(_upsample_matrix(s, H))
        Aw = jnp.asarray(_upsample_matrix(s, W))
        priors.append(jnp.einsum('hi,noij,wj->nohw', Ah, y, Aw))
    cat = jnp.concatenate(priors + [x], axis=1)
    out = lax.conv_general_dilated(cat, params["w2"], (1, 1), ((1, 1), (1, 1)),
                                   dimension_numbers=('NCHW', 'OIHW', 'NCHW'))
    sc2 = params["gamma2"] / jnp.sqrt(params["var2"] + EPS)
    out = out * sc2[None, :, None, None] + \
        (params["beta2"] - params["mean2"] * sc2)[None, :, None, None]
    return jnp.maximum(out, 0.0)


if __name__ == "__main__":
    key = jax.random.PRNGKey(0)
    ks = jax.random.split(key, 12)

    N, C_in, H, W = 2, 4, 16, 16          # features = 4
    C_out = 32                            # out_features (small synthetic)
    sizes = (1, 2, 3, 6)
    S = len(sizes)
    C_cat = C_in + S * C_out

    params = dict(
        w1=jax.random.normal(ks[0], (S, C_out, C_in), jnp.float32) * 0.2,
        gamma1=1.0 + 0.1 * jax.random.normal(ks[1], (S, C_out), jnp.float32),
        beta1=0.1 * jax.random.normal(ks[2], (S, C_out), jnp.float32),
        mean1=0.1 * jax.random.normal(ks[3], (S, C_out), jnp.float32),
        var1=jax.random.uniform(ks[4], (S, C_out), jnp.float32, 0.5, 1.5),
        w2=jax.random.normal(ks[5], (C_out, C_cat, 3, 3), jnp.float32) * 0.05,
        gamma2=1.0 + 0.1 * jax.random.normal(ks[6], (C_out,), jnp.float32),
        beta2=0.1 * jax.random.normal(ks[7], (C_out,), jnp.float32),
        mean2=0.1 * jax.random.normal(ks[8], (C_out,), jnp.float32),
        var2=jax.random.uniform(ks[9], (C_out,), jnp.float32, 0.5, 1.5),
    )
    x = jax.random.normal(ks[10], (N, C_in, H, W), jnp.float32)

    ref = jax.block_until_ready(ref_forward(x, params, sizes))

    # strict check: f32 compute path
    out_f32 = jax.block_until_ready(psp_forward(x, params, sizes, jnp.float32))
    assert out_f32.shape == (N, C_out, H, W), out_f32.shape
    err = float(jnp.max(jnp.abs(out_f32 - ref)))
    assert err < 2e-3, f"f32 max abs diff {err}"

    # bf16 matmul-operand path (MXU-friendly on v6e/v7x), looser tolerance
    out_bf16 = jax.block_until_ready(psp_forward(x, params, sizes, jnp.bfloat16))
    err_bf = float(jnp.max(jnp.abs(out_bf16 - ref)))
    assert err_bf < 5e-2, f"bf16 max abs diff {err_bf}"

    print("KERNEL_OK")
</pallas_src>

<mosaic_0001>
module attributes {stable_mosaic.version = 11 : i64} {
  func.func @stage_kernel(%arg0: i32, %arg1: memref<1x4x256xf32, #tpu.memory_space<vmem>>, %arg2: memref<4x256x36xf32, #tpu.memory_space<vmem>>, %arg3: memref<4x36x256xf32, #tpu.memory_space<vmem>>, %arg4: memref<4x32x4xf32, #tpu.memory_space<vmem>>, %arg5: memref<4x32x1xf32, #tpu.memory_space<vmem>>, %arg6: memref<1x128x256xf32, #tpu.memory_space<vmem>>) attributes {dimension_semantics = [#tpu.dimension_semantics<parallel>], iteration_bounds = array<i64: 2>, scalar_prefetch = 0 : i64, scratch_operands = 0 : i64, tpu.core_type = #tpu.core_type<tc>, window_params = [{transform_indices = @transform_0, window_bounds = array<i64: 1, 4, 256>}, {pipeline_mode = #tpu.pipeline_mode<synchronous>, transform_indices = @transform_1, window_bounds = array<i64: 4, 256, 36>}, {pipeline_mode = #tpu.pipeline_mode<synchronous>, transform_indices = @transform_2, window_bounds = array<i64: 4, 36, 256>}, {pipeline_mode = #tpu.pipeline_mode<synchronous>, transform_indices = @transform_3, window_bounds = array<i64: 4, 32, 4>}, {pipeline_mode = #tpu.pipeline_mode<synchronous>, transform_indices = @transform_4, window_bounds = array<i64: 4, 32, 1>}, {transform_indices = @transform_5, window_bounds = array<i64: 1, 128, 256>}]} {
    %c0 = arith.constant 0 : index
    %c0_0 = arith.constant 0 : index
    %c0_1 = arith.constant 0 : index
    %0 = vector.load %arg1[%c0, %c0_0, %c0_1] : memref<1x4x256xf32, #tpu.memory_space<vmem>>, vector<1x4x256xf32>
    %1 = vector.shape_cast %0 : vector<1x4x256xf32> to vector<4x256xf32>
    %c0_2 = arith.constant 0 : index
    %c0_3 = arith.constant 0 : index
    %c0_4 = arith.constant 0 : index
    %2 = vector.load %arg2[%c0_2, %c0_3, %c0_4] : memref<4x256x36xf32, #tpu.memory_space<vmem>>, vector<1x256x36xf32>
    %3 = vector.shape_cast %2 : vector<1x256x36xf32> to vector<256x36xf32>
    %cst = arith.constant dense<0.000000e+00> : vector<4x36xf32>
    %4 = tpu.matmul %1, %3, %cst {dimension_numbers = #tpu.dot_dimension_numbers<[1], [0], [0], [1], [0, 0, 1, 1], [], []>} : vector<4x256xf32>, vector<256x36xf32>, vector<4x36xf32> -> vector<4x36xf32>
    %c0_5 = arith.constant 0 : index
    %c0_6 = arith.constant 0 : index
    %c0_7 = arith.constant 0 : index
    %5 = vector.load %arg4[%c0_5, %c0_6, %c0_7] : memref<4x32x4xf32, #tpu.memory_space<vmem>>, vector<1x32x4xf32>
    %6 = vector.shape_cast %5 : vector<1x32x4xf32> to vector<32x4xf32>
    %cst_8 = arith.constant dense<0.000000e+00> : vector<32x36xf32>
    %7 = tpu.matmul %6, %4, %cst_8 {dimension_numbers = #tpu.dot_dimension_numbers<[1], [0], [0], [1], [0, 0, 1, 1], [], []>} : vector<32x4xf32>, vector<4x36xf32>, vector<32x36xf32> -> vector<32x36xf32>
    %c0_9 = arith.constant 0 : index
    %c0_10 = arith.constant 0 : index
    %c0_11 = arith.constant 0 : index
    %8 = vector.load %arg3[%c0_9, %c0_10, %c0_11] : memref<4x36x256xf32, #tpu.memory_space<vmem>>, vector<1x36x256xf32>
    %9 = vector.shape_cast %8 : vector<1x36x256xf32> to vector<36x256xf32>
    %cst_12 = arith.constant dense<0.000000e+00> : vector<32x256xf32>
    %10 = tpu.matmul %7, %9, %cst_12 {dimension_numbers = #tpu.dot_dimension_numbers<[1], [0], [0], [1], [0, 0, 1, 1], [], []>} : vector<32x36xf32>, vector<36x256xf32>, vector<32x256xf32> -> vector<32x256xf32>
    %c0_13 = arith.constant 0 : index
    %c0_14 = arith.constant 0 : index
    %c0_15 = arith.constant 0 : index
    %11 = vector.load %arg5[%c0_13, %c0_14, %c0_15] : memref<4x32x1xf32, #tpu.memory_space<vmem>>, vector<1x32x1xf32>
    %12 = vector.shape_cast %11 : vector<1x32x1xf32> to vector<32x1xf32>
    %13 = vector.broadcast %12 : vector<32x1xf32> to vector<32x256xf32>
    %14 = arith.addf %10, %13 : vector<32x256xf32>
    %c0_16 = arith.constant 0 : index
    %c0_17 = arith.constant 0 : index
    %c0_18 = arith.constant 0 : index
    %15 = vector.load %arg6[%c0_16, %c0_17, %c0_18] : memref<1x128x256xf32, #tpu.memory_space<vmem>>, vector<1x32x256xf32>
    %16 = vector.shape_cast %15 : vector<1x32x256xf32> to vector<32x256xf32>
    %17 = vector.shape_cast %14 : vector<32x256xf32> to vector<1x32x256xf32>
    tpu.vector_store %arg6[%c0_16, %c0_17, %c0_18], %17 {strides = array<i32>} : memref<1x128x256xf32, #tpu.memory_space<vmem>>, vector<1x32x256xf32>,
    %c1 = arith.constant 1 : index
    %c0_19 = arith.constant 0 : index
    %c0_20 = arith.constant 0 : index
    %18 = vector.load %arg2[%c1, %c0_19, %c0_20] : memref<4x256x36xf32, #tpu.memory_space<vmem>>, vector<1x256x36xf32>
    %19 = vector.shape_cast %18 : vector<1x256x36xf32> to vector<256x36xf32>
    %cst_21 = arith.constant dense<0.000000e+00> : vector<4x36xf32>
    %20 = tpu.matmul %1, %19, %cst_21 {dimension_numbers = #tpu.dot_dimension_numbers<[1], [0], [0], [1], [0, 0, 1, 1], [], []>} : vector<4x256xf32>, vector<256x36xf32>, vector<4x36xf32> -> vector<4x36xf32>
    %c1_22 = arith.constant 1 : index
    %c0_23 = arith.constant 0 : index
    %c0_24 = arith.constant 0 : index
    %21 = vector.load %arg4[%c1_22, %c0_23, %c0_24] : memref<4x32x4xf32, #tpu.memory_space<vmem>>, vector<1x32x4xf32>
    %22 = vector.shape_cast %21 : vector<1x32x4xf32> to vector<32x4xf32>
    %cst_25 = arith.constant dense<0.000000e+00> : vector<32x36xf32>
    %23 = tpu.matmul %22, %20, %cst_25 {dimension_numbers = #tpu.dot_dimension_numbers<[1], [0], [0], [1], [0, 0, 1, 1], [], []>} : vector<32x4xf32>, vector<4x36xf32>, vector<32x36xf32> -> vector<32x36xf32>
    %c1_26 = arith.constant 1 : index
    %c0_27 = arith.constant 0 : index
    %c0_28 = arith.constant 0 : index
    %24 = vector.load %arg3[%c1_26, %c0_27, %c0_28] : memref<4x36x256xf32, #tpu.memory_space<vmem>>, vector<1x36x256xf32>
    %25 = vector.shape_cast %24 : vector<1x36x256xf32> to vector<36x256xf32>
    %cst_29 = arith.constant dense<0.000000e+00> : vector<32x256xf32>
    %26 = tpu.matmul %23, %25, %cst_29 {dimension_numbers = #tpu.dot_dimension_numbers<[1], [0], [0], [1], [0, 0, 1, 1], [], []>} : vector<32x36xf32>, vector<36x256xf32>, vector<32x256xf32> -> vector<32x256xf32>
    %c1_30 = arith.constant 1 : index
    %c0_31 = arith.constant 0 : index
    %c0_32 = arith.constant 0 : index
    %27 = vector.load %arg5[%c1_30, %c0_31, %c0_32] : memref<4x32x1xf32, #tpu.memory_space<vmem>>, vector<1x32x1xf32>
    %28 = vector.shape_cast %27 : vector<1x32x1xf32> to vector<32x1xf32>
    %29 = vector.broadcast %28 : vector<32x1xf32> to vector<32x256xf32>
    %30 = arith.addf %26, %29 : vector<32x256xf32>
    %c0_33 = arith.constant 0 : index
    %c32 = arith.constant 32 : index
    %c0_34 = arith.constant 0 : index
    %31 = vector.load %arg6[%c0_33, %c32, %c0_34] : memref<1x128x256xf32, #tpu.memory_space<vmem>>, vector<1x32x256xf32>
    %32 = vector.shape_cast %31 : vector<1x32x256xf32> to vector<32x256xf32>
    %33 = vector.shape_cast %30 : vector<32x256xf32> to vector<1x32x256xf32>
    tpu.vector_store %arg6[%c0_33, %c32, %c0_34], %33 {strides = array<i32>} : memref<1x128x256xf32, #tpu.memory_space<vmem>>, vector<1x32x256xf32>,
    %c2 = arith.constant 2 : index
    %c0_35 = arith.constant 0 : index
    %c0_36 = arith.constant 0 : index
    %34 = vector.load %arg2[%c2, %c0_35, %c0_36] : memref<4x256x36xf32, #tpu.memory_space<vmem>>, vector<1x256x36xf32>
    %35 = vector.shape_cast %34 : vector<1x256x36xf32> to vector<256x36xf32>
    %cst_37 = arith.constant dense<0.000000e+00> : vector<4x36xf32>
    %36 = tpu.matmul %1, %35, %cst_37 {dimension_numbers = #tpu.dot_dimension_numbers<[1], [0], [0], [1], [0, 0, 1, 1], [], []>} : vector<4x256xf32>, vector<256x36xf32>, vector<4x36xf32> -> vector<4x36xf32>
    %c2_38 = arith.constant 2 : index
    %c0_39 = arith.constant 0 : index
    %c0_40 = arith.constant 0 : index
    %37 = vector.load %arg4[%c2_38, %c0_39, %c0_40] : memref<4x32x4xf32, #tpu.memory_space<vmem>>, vector<1x32x4xf32>
    %38 = vector.shape_cast %37 : vector<1x32x4xf32> to vector<32x4xf32>
    %cst_41 = arith.constant dense<0.000000e+00> : vector<32x36xf32>
    %39 = tpu.matmul %38, %36, %cst_41 {dimension_numbers = #tpu.dot_dimension_numbers<[1], [0], [0], [1], [0, 0, 1, 1], [], []>} : vector<32x4xf32>, vector<4x36xf32>, vector<32x36xf32> -> vector<32x36xf32>
    %c2_42 = arith.constant 2 : index
    %c0_43 = arith.constant 0 : index
    %c0_44 = arith.constant 0 : index
    %40 = vector.load %arg3[%c2_42, %c0_43, %c0_44] : memref<4x36x256xf32, #tpu.memory_space<vmem>>, vector<1x36x256xf32>
    %41 = vector.shape_cast %40 : vector<1x36x256xf32> to vector<36x256xf32>
    %cst_45 = arith.constant dense<0.000000e+00> : vector<32x256xf32>
    %42 = tpu.matmul %39, %41, %cst_45 {dimension_numbers = #tpu.dot_dimension_numbers<[1], [0], [0], [1], [0, 0, 1, 1], [], []>} : vector<32x36xf32>, vector<36x256xf32>, vector<32x256xf32> -> vector<32x256xf32>
    %c2_46 = arith.constant 2 : index
    %c0_47 = arith.constant 0 : index
    %c0_48 = arith.constant 0 : index
    %43 = vector.load %arg5[%c2_46, %c0_47, %c0_48] : memref<4x32x1xf32, #tpu.memory_space<vmem>>, vector<1x32x1xf32>
    %44 = vector.shape_cast %43 : vector<1x32x1xf32> to vector<32x1xf32>
    %45 = vector.broadcast %44 : vector<32x1xf32> to vector<32x256xf32>
    %46 = arith.addf %42, %45 : vector<32x256xf32>
    %c0_49 = arith.constant 0 : index
    %c64 = arith.constant 64 : index
    %c0_50 = arith.constant 0 : index
    %47 = vector.load %arg6[%c0_49, %c64, %c0_50] : memref<1x128x256xf32, #tpu.memory_space<vmem>>, vector<1x32x256xf32>
    %48 = vector.shape_cast %47 : vector<1x32x256xf32> to vector<32x256xf32>
    %49 = vector.shape_cast %46 : vector<32x256xf32> to vector<1x32x256xf32>
    tpu.vector_store %arg6[%c0_49, %c64, %c0_50], %49 {strides = array<i32>} : memref<1x128x256xf32, #tpu.memory_space<vmem>>, vector<1x32x256xf32>,
    %c3 = arith.constant 3 : index
    %c0_51 = arith.constant 0 : index
    %c0_52 = arith.constant 0 : index
    %50 = vector.load %arg2[%c3, %c0_51, %c0_52] : memref<4x256x36xf32, #tpu.memory_space<vmem>>, vector<1x256x36xf32>
    %51 = vector.shape_cast %50 : vector<1x256x36xf32> to vector<256x36xf32>
    %cst_53 = arith.constant dense<0.000000e+00> : vector<4x36xf32>
    %52 = tpu.matmul %1, %51, %cst_53 {dimension_numbers = #tpu.dot_dimension_numbers<[1], [0], [0], [1], [0, 0, 1, 1], [], []>} : vector<4x256xf32>, vector<256x36xf32>, vector<4x36xf32> -> vector<4x36xf32>
    %c3_54 = arith.constant 3 : index
    %c0_55 = arith.constant 0 : index
    %c0_56 = arith.constant 0 : index
    %53 = vector.load %arg4[%c3_54, %c0_55, %c0_56] : memref<4x32x4xf32, #tpu.memory_space<vmem>>, vector<1x32x4xf32>
    %54 = vector.shape_cast %53 : vector<1x32x4xf32> to vector<32x4xf32>
    %cst_57 = arith.constant dense<0.000000e+00> : vector<32x36xf32>
    %55 = tpu.matmul %54, %52, %cst_57 {dimension_numbers = #tpu.dot_dimension_numbers<[1], [0], [0], [1], [0, 0, 1, 1], [], []>} : vector<32x4xf32>, vector<4x36xf32>, vector<32x36xf32> -> vector<32x36xf32>
    %c3_58 = arith.constant 3 : index
    %c0_59 = arith.constant 0 : index
    %c0_60 = arith.constant 0 : index
    %56 = vector.load %arg3[%c3_58, %c0_59, %c0_60] : memref<4x36x256xf32, #tpu.memory_space<vmem>>, vector<1x36x256xf32>
    %57 = vector.shape_cast %56 : vector<1x36x256xf32> to vector<36x256xf32>
    %cst_61 = arith.constant dense<0.000000e+00> : vector<32x256xf32>
    %58 = tpu.matmul %55, %57, %cst_61 {dimension_numbers = #tpu.dot_dimension_numbers<[1], [0], [0], [1], [0, 0, 1, 1], [], []>} : vector<32x36xf32>, vector<36x256xf32>, vector<32x256xf32> -> vector<32x256xf32>
    %c3_62 = arith.constant 3 : index
    %c0_63 = arith.constant 0 : index
    %c0_64 = arith.constant 0 : index
    %59 = vector.load %arg5[%c3_62, %c0_63, %c0_64] : memref<4x32x1xf32, #tpu.memory_space<vmem>>, vector<1x32x1xf32>
    %60 = vector.shape_cast %59 : vector<1x32x1xf32> to vector<32x1xf32>
    %61 = vector.broadcast %60 : vector<32x1xf32> to vector<32x256xf32>
    %62 = arith.addf %58, %61 : vector<32x256xf32>
    %c0_65 = arith.constant 0 : index
    %c96 = arith.constant 96 : index
    %c0_66 = arith.constant 0 : index
    %63 = vector.load %arg6[%c0_65, %c96, %c0_66] : memref<1x128x256xf32, #tpu.memory_space<vmem>>, vector<1x32x256xf32>
    %64 = vector.shape_cast %63 : vector<1x32x256xf32> to vector<32x256xf32>
    %65 = vector.shape_cast %62 : vector<32x256xf32> to vector<1x32x256xf32>
    tpu.vector_store %arg6[%c0_65, %c96, %c0_66], %65 {strides = array<i32>} : memref<1x128x256xf32, #tpu.memory_space<vmem>>, vector<1x32x256xf32>,
    return
  }
  func.func @transform_0(%arg0: i32) -> (i32, i32, i32) {
    %c0_i32 = arith.constant 0 : i32
    %c0_i32_0 = arith.constant 0 : i32
    %c0_i32_1 = arith.constant 0 : i32
    return %arg0, %c0_i32, %c0_i32_0 : i32, i32, i32
  }
  func.func @transform_1(%arg0: i32) -> (i32, i32, i32) {
    %c0_i32 = arith.constant 0 : i32
    %c0_i32_0 = arith.constant 0 : i32
    %c0_i32_1 = arith.constant 0 : i32
    %c0_i32_2 = arith.constant 0 : i32
    return %c0_i32, %c0_i32_0, %c0_i32_1 : i32, i32, i32
  }
  func.func @transform_2(%arg0: i32) -> (i32, i32, i32) {
    %c0_i32 = arith.constant 0 : i32
    %c0_i32_0 = arith.constant 0 : i32
    %c0_i32_1 = arith.constant 0 : i32
    %c0_i32_2 = arith.constant 0 : i32
    return %c0_i32, %c0_i32_0, %c0_i32_1 : i32, i32, i32
  }
  func.func @transform_3(%arg0: i32) -> (i32, i32, i32) {
    %c0_i32 = arith.constant 0 : i32
    %c0_i32_0 = arith.constant 0 : i32
    %c0_i32_1 = arith.constant 0 : i32
    %c0_i32_2 = arith.constant 0 : i32
    return %c0_i32, %c0_i32_0, %c0_i32_1 : i32, i32, i32
  }
  func.func @transform_4(%arg0: i32) -> (i32, i32, i32) {
    %c0_i32 = arith.constant 0 : i32
    %c0_i32_0 = arith.constant 0 : i32
    %c0_i32_1 = arith.constant 0 : i32
    %c0_i32_2 = arith.constant 0 : i32
    return %c0_i32, %c0_i32_0, %c0_i32_1 : i32, i32, i32
  }
  func.func @transform_5(%arg0: i32) -> (i32, i32, i32) {
    %c0_i32 = arith.constant 0 : i32
    %c0_i32_0 = arith.constant 0 : i32
    %c0_i32_1 = arith.constant 0 : i32
    return %arg0, %c0_i32, %c0_i32_0 : i32, i32, i32
  }
}

</mosaic_0001>

<bundles_post_ra>
// kernel: tpu_custom_call.1
= control target key start
LH: loop header
LB: loop body
LE: loop exit
PB: predicated region body
PF: predicated region fallthrough
CT: control target
= control target key end

     0   :  { %10 = vsyncpa [#allocation3], 0  ;;  %s2446_s0 = inlined_call_operand.vmem [shape: f32[2,4,256], index: 0, kind: input, shape index: {}]   ;;  %s2447_s1 = inlined_call_operand.vmem [shape: f32[4,256,36], index: 1, kind: input, shape index: {}]   ;;  %s2448_s2 = inlined_call_operand.vmem [shape: f32[4,36,256], index: 2, kind: input, shape index: {}]   ;;  %s2449_s3 = inlined_call_operand.vmem [shape: f32[4,32,4], index: 3, kind: input, shape index: {}]   ;;  %s2450_s4 = inlined_call_operand.vmem [shape: f32[4,32,1], index: 4, kind: input, shape index: {}]   ;;  %s2451_s5 = inlined_call_operand.hbm [shape: f32[2,128,256], index: 5, kind: output, shape index: {}]  }
   0x1   :  { %12 = vsyncpa [#allocation3 + $0x1], 0  ;;  %s1656_s18 = smov 0   ;;  %s1658_s19 = smov 0  }
   0x2   :  { %s1660_s20 = smov 0   ;;  %s1662_s21 = smov 0  }
   0x3 LB: > { %s1677_s22 = sadd.s32 4294967295, %s1621_s21   ;;  %s1290_s23 = sadd.s32 4294967294, %s1621_s21   ;;  %s1621_s21 = sphi %s1662_s21, %s2457_s21   ;;  %s1617_s20 = sphi %s1660_s20, %s2456_s20   ;;  %s1613_s19 = sphi %s1658_s19, %s2455_s19   ;;  %s1609_s18 = sphi %s1656_s18, %s2454_s18  }
   0x4   : > { %s1681_s24 = sadd.s32 1, %s1621_s21   ;;  %s135_s25 = sadd.s32 1, %s1617_s20 }
   0x5   : > { %s132_s26 = ssub.s32 %s1621_s21, %s1681_s24  ;;  %p145_p0 = scmp.ne.s32.totalorder %s1617_s20, %s1613_s19 }
   0x6   : > { %p133_p1 = scmp.eq.s32.totalorder %s132_s26, 0  ;;  %p146_p2 = scmp.eq.s32.totalorder %s1677_s22, 1 }
   0x7   : > { %p151_p3 = scmp.ne.s32.totalorder %s1613_s19, %s1609_s18  ;;  %p152_p4 = scmp.eq.s32.totalorder %s1290_s23, 1 }
   0x8   : > { %s1692_s27 = scalar_select %p133_p1, %s1617_s20, %s135_s25  }
   0x9   : > { %p1694_p5 = por %p146_p2, %p145_p0  ;;  %p1698_p6 = por %p152_p4, %p151_p3 }
   0xa   : > { %p1293_p7 = scmp.ge.s32.totalorder %s1621_s21, 1  ;;  %p190_p8 = scmp.lt.s32.totalorder %s1621_s21, 3 }
   0xc   : > { %p191_p9 = pnand %p1293_p7, %p190_p8 }
   0xd   : > { %p218_p10 = scmp.lt.s32.totalorder (!%p191_p9), %s1677_s22, 1  ;;  %s215_s14 = sand.u32 (!%p191_p9), 1, %s1613_s19  }
   0xe   : > { %194 = sbr.rel (%p191_p9) target bundleno = 1355 (0x54b), region = 40  ;;  %s1294_s15 = sshll.u32 (!%p191_p9), %s215_s14, 8 }
   0xf   : > { %s1978_s16 = scalar_lea.vmem (!%p191_p9), [#allocation2], %s1294_s15  ;;  %s1579_s9 = scalar_lea.hbm (!%p191_p9), %s2451_s5, 512 }
  0x10   : > { %s1225_s25 = sshll.u32 (!%p191_p9), %s1978_s16, 4  ;;  %s1226_s25 = int_to_ptr.vmem [resolvable:$true] %s1225_s25 }
  0x13   : > { %v239_v0 = vld [vmem:[%s2447_s1 + $0x78] sm:$0xff]  ;;  %v238_v2 = vld [vmem:[%s2447_s1 + $0x70] sm:$0xff]  ;;  %v237_v4 = vld [vmem:[%s2447_s1 + $0x68] sm:$0xff]  ;;  %s219_s17 = scalar_select %p218_p10, %s1677_s22, 1  ;;  %vm319_vm0 = vcmask 1043456   ;;  %vm306_vm1 = vcmask 31744  }
  0x14   : > { %v255_v1 = vld [vmem:[%s2447_s1 + $0xf8] sm:$0xff]  ;;  %262 = vmatpush.msra.mxu0 %v239_v0  ;;  %v254_v3 = vld [vmem:[%s2447_s1 + $0xf0] sm:$0xff]  ;;  %v253_v5 = vld [vmem:[%s2447_s1 + $0xe8] sm:$0xff]  ;;  %vm386_vm2 = vcmask 293888  }
  0x15   : > { %282 = vmatpush.msra.mxu1 %v255_v1  ;;  %v236_v6 = vld [vmem:[%s2447_s1 + $0x60] sm:$0xff]  ;;  %s1512_s6 = sshll.u32 %s219_s17, 3  ;;  %v235_v8 = vld [vmem:[%s2447_s1 + $0x58] sm:$0xff]  ;;  %v234_v10 = vld [vmem:[%s2447_s1 + $0x50] sm:$0xff]  ;;  %v1623_v1 = vmov 0  }
  0x16   : > { %263 = vmatpush.msra.mxu0 %v238_v2  ;;  %v252_v7 = vld [vmem:[%s2447_s1 + $0xe0] sm:$0xff]  ;;  %v251_v9 = vld [vmem:[%s2447_s1 + $0xd8] sm:$0xff]  ;;  %s222_s13 = scalar_lea.vmem %s2446_s0, %s1512_s6  ;;  %v250_v11 = vld [vmem:[%s2447_s1 + $0xd0] sm:$0xff]  ;;  %1556 = vset.pattern.permute.xlu0 %v1623_v1 }
  0x17   : > { %283 = vmatpush.msra.mxu1 %v254_v3  ;;  %v233_v12 = vld [vmem:[%s2447_s1 + $0x48] sm:$0xff]  ;;  %v1751_v14 = vld [vmem:[%s222_s13] sm:$0xff]  ;;  %v231_v17 = vld [vmem:[%s2447_s1 + $0x38] sm:$0xff]  ;;  %1557 = vset.pattern.permute.xlu1 %v1623_v1  ;;  %s1513_s13 = sshll.u32 %s1677_s22, 8  ;;  %s1213_s22 = scalar_lea.sflag [#allocation3], %s215_s14 }
  0x18   : > { %264 = vmatpush.msra.mxu0 %v237_v4  ;;  %v249_v13 = vld [vmem:[%s2447_s1 + $0xc8] sm:$0xff]  ;;  %257 = vst [vmem:[#allocation1] ss:$2 sm:$0xff] %v1751_v14  ;;  %v232_v15 = vld [vmem:[%s2447_s1 + $0x40] sm:$0xff]  ;;  %v247_v18 = vld [vmem:[%s2447_s1 + $0xb8] sm:$0xff]  ;;  %1558 = vset.pattern.permute.xlu2 %v1623_v1  ;;  %s1224_s23 = scalar_lea.hbm %s2451_s5, %s1513_s13 }
  0x19   : > { %284 = vmatpush.msra.mxu1 %v253_v5  ;;  %v248_v16 = vld [vmem:[%s2447_s1 + $0xc0] sm:$0xff]  ;;  %v230_v19 = vld [vmem:[%s2447_s1 + $0x30] sm:$0xff]  ;;  %v229_v21 = vld [vmem:[%s2447_s1 + $0x28] sm:$0xff]  ;;  %s1227_s26 = sshll.u32 %s1224_s23, 4  ;;  %s1228_s26 = int_to_ptr.hbm [resolvable:$true] %s1227_s26 }
  0x1a   : > { %265 = vmatpush.msra.mxu0 %v236_v6  ;;  %v246_v20 = vld [vmem:[%s2447_s1 + $0xb0] sm:$0xff]  ;;  %v245_v22 = vld [vmem:[%s2447_s1 + $0xa8] sm:$0xff]  ;;  %v228_v25 = vld [vmem:[%s2447_s1 + $0x20] sm:$0xff]  ;;  %s1573_s30 = sshra.s32 %s1228_s26, 4  ;;  %s1574_s30 = int_to_ptr.hbm [resolvable:$true] %s1573_s30 }
  0x1b   : > { %285 = vmatpush.msra.mxu1 %v252_v7  ;;  %v244_v26 = vld [vmem:[%s2447_s1 + $0xa0] sm:$0xff]  ;;  %v227_v27 = vld [vmem:[%s2447_s1 + $0x18] sm:$0xff]  ;;  %v226_v29 = vld [vmem:[%s2447_s1 + $0x10] sm:$0xff]  ;;  %s1575_s6 = scalar_lea.hbm %s1574_s30, 256  ;;  %p1580_p0 = scmp.lt.s32.totalorder %s1574_s30, %s2451_s5 }
  0x1c   : > { %266 = vmatpush.msra.mxu0 %v235_v8  ;;  %v243_v28 = vld [vmem:[%s2447_s1 + $0x98] sm:$0xff]  ;;  %v242_v30 = vld [vmem:[%s2447_s1 + $0x90] sm:$0xff]  ;;  %v225_v31 = vld [vmem:[%s2447_s1 + $0x8] sm:$0xff]  ;;  %p1576_p11 = scmp.ne.s32.totalorder %s1574_s30, %s1575_s6  ;;  %p1581_p1 = scmp.lt.s32.totalorder %s1579_s9, %s1575_s6 }
  0x1d   : > { %286 = vmatpush.msra.mxu1 %v251_v9  ;;  %v241_v32 = vld [vmem:[%s2447_s1 + $0x88] sm:$0xff]  ;;  %v224_v33 = vld [vmem:[%s2447_s1] sm:$0xff]  ;;  %v358_v36 = vld [vmem:[%s2448_s2 + $0x30] sm:$0xff] }
  0x1e   : > { %267 = vmatpush.msra.mxu0 %v234_v10  ;;  %v240_v34 = vld [vmem:[%s2447_s1 + $0x80] sm:$0xff]  ;;  %v354_v40 = vld [vmem:[%s2448_s2 + $0x10] sm:$0xff]  ;;  %v361_v43 = vld [vmem:[%s2448_s2 + $0x48] sm:$0xf]  ;;  %p1577_p12 = pnand %p1576_p11, %p1694_p5  ;;  %p1582_p2 = por %p1581_p1, %p1580_p0 }
  0x1f   : > { %287 = vmatpush.msra.mxu1 %v250_v11  ;;  %v258_v23 = vld.sshfl [vmem:[#allocation1] sm:$0xff pattern:$0x75316420]  ;;  %v259_v24 = vld.sshfl [vmem:[#allocation1 + $0x8] sm:$0xff pattern:$0x75316420] }
  0x20   : > { %268 = vmatpush.msra.mxu0 %v233_v12  ;;  %504 = vst [vmem:[#allocation1] ss:$2 sm:$0xff] %v1751_v14  ;;  %v360_v35 = vld [vmem:[%s2448_s2 + $0x40] sm:$0xf]  ;;  %v359_v44 = vld [vmem:[%s2448_s2 + $0x38] sm:$0xff]  ;;  %v357_v45 = vld [vmem:[%s2448_s2 + $0x28] sm:$0xff]  ;;  %p1578_p13 = pneg %p1577_p12 }
  0x21   : > { %288 = vmatpush.msra.mxu1 %v249_v13  ;;  %1302 = vmatpush.msk.msra.mxu3 %vm319_vm0, %v360_v35  ;;  %v356_v37 = vld [vmem:[%s2448_s2 + $0x20] sm:$0xff]  ;;  %v355_v46 = vld [vmem:[%s2448_s2 + $0x18] sm:$0xff]  ;;  %v303_v47 = vld [vmem:[%s2449_s3 + $0x8] sm:$0xff] }
  0x22   : > { %269 = vmatpush.msra.mxu0 %v232_v15  ;;  %v302_v42 = vld [vmem:[%s2449_s3] sm:$0xff]  ;;  %v304_v48 = vld [vmem:[%s2449_s3 + $0x10] sm:$0xff]  ;;  %v305_v49 = vld [vmem:[%s2449_s3 + $0x18] sm:$0xff]  ;;  %p1583_p3 = pnand %p1582_p2, %p1578_p13 }
  0x23   : > { %289 = vmatpush.msra.mxu1 %v248_v16  ;;  %417 = vmatpush.msra.mxu3 %v358_v36  ;;  %v352_v50 = vld [vmem:[%s2448_s2] sm:$0xff]  ;;  %v353_v51 = vld [vmem:[%s2448_s2 + $0x8] sm:$0xff]  ;;  %v1327_v52 = vld [vmem:[%s2447_s1 + $0x178] sm:$0xff] }
  0x24   : > { %270 = vmatpush.msra.mxu0 %v231_v17  ;;  %v1326_v53 = vld [vmem:[%s2447_s1 + $0x170] sm:$0xff]  ;;  %v1325_v54 = vld [vmem:[%s2447_s1 + $0x168] sm:$0xff]  ;;  %v1324_v55 = vld [vmem:[%s2447_s1 + $0x160] sm:$0xff] }
  0x25   : > { %290 = vmatpush.msra.mxu1 %v247_v18  ;;  %418 = vmatpush.msra.mxu3 %v356_v37  ;;  %v1343_v56 = vld [vmem:[%s2447_s1 + $0x1f8] sm:$0xff]  ;;  %v1342_v58 = vld [vmem:[%s2447_s1 + $0x1f0] sm:$0xff]  ;;  %v1341_v60 = vld [vmem:[%s2447_s1 + $0x1e8] sm:$0xff] }
  0x26   : > { %271 = vmatpush.msra.mxu0 %v230_v19  ;;  %v1323_v57 = vld [vmem:[%s2447_s1 + $0x158] sm:$0xff]  ;;  %v1322_v59 = vld [vmem:[%s2447_s1 + $0x150] sm:$0xff]  ;;  %v1321_v61 = vld [vmem:[%s2447_s1 + $0x148] sm:$0xff] }
  0x27   : > { %291 = vmatpush.msra.mxu1 %v246_v20  ;;  %419 = vmatpush.msra.mxu3 %v354_v40  ;;  %v1340_v62 = vld [vmem:[%s2447_s1 + $0x1e0] sm:$0xff]  ;;  %v1339_v0 = vld [vmem:[%s2447_s1 + $0x1d8] sm:$0xff]  ;;  %v1338_v4 = vld [vmem:[%s2447_s1 + $0x1d0] sm:$0xff] }
  0x28   : > { %272 = vmatpush.msra.mxu0 %v229_v21  ;;  %v1320_v63 = vld [vmem:[%s2447_s1 + $0x140] sm:$0xff]  ;;  %v1319_v3 = vld [vmem:[%s2447_s1 + $0x138] sm:$0xff]  ;;  %v1318_v5 = vld [vmem:[%s2447_s1 + $0x130] sm:$0xff] }
  0x29   : > { %292 = vmatpush.msra.mxu1 %v245_v22  ;;  %420 = vmatpush.msra.mxu3 %v352_v50  ;;  %v362_v2 = vld [vmem:[%s2450_s4] sm:$0xff]  ;;  %v1337_v6 = vld [vmem:[%s2447_s1 + $0x1c8] sm:$0xff]  ;;  %v1335_v10 = vld [vmem:[%s2447_s1 + $0x1b8] sm:$0xff] }
  0x2a   : > { %273 = vmatpush.msra.mxu0 %v228_v25  ;;  %368 = vperm.xlu0 %1556, %v362_v2   ;;  %v1317_v7 = vld [vmem:[%s2447_s1 + $0x128] sm:$0xff]  ;;  %v1336_v8 = vld [vmem:[%s2447_s1 + $0x1c0] sm:$0xff]  ;;  %v1315_v12 = vld [vmem:[%s2447_s1 + $0x118] sm:$0xff] }
  0x2b   : > { %293 = vmatpush.msra.mxu1 %v244_v26  ;;  %509 = vmatpush.msrb.mxu3 %v1327_v52  ;;  %v1316_v9 = vld [vmem:[%s2447_s1 + $0x120] sm:$0xff]  ;;  %v363_v11 = vld [vmem:[%s2450_s4 + $0x8] sm:$0xff]  ;;  %v1334_v13 = vld [vmem:[%s2447_s1 + $0x1b0] sm:$0xff] }
  0x2c   : > { %274 = vmatpush.msra.mxu0 %v227_v27  ;;  %v1314_v15 = vld [vmem:[%s2447_s1 + $0x110] sm:$0xff]  ;;  %v1333_v16 = vld [vmem:[%s2447_s1 + $0x1a8] sm:$0xff]  ;;  %v1332_v18 = vld [vmem:[%s2447_s1 + $0x1a0] sm:$0xff] }
  0x2d   : > { %294 = vmatpush.msra.mxu1 %v243_v28  ;;  %510 = vmatpush.msrb.mxu3 %v1326_v53  ;;  %v1313_v17 = vld [vmem:[%s2447_s1 + $0x108] sm:$0xff]  ;;  %v1312_v19 = vld [vmem:[%s2447_s1 + $0x100] sm:$0xff]  ;;  %v1331_v20 = vld [vmem:[%s2447_s1 + $0x198] sm:$0xff] }
  0x2e   : > { %275 = vmatpush.msra.mxu0 %v226_v29  ;;  %v364_v22 = vld [vmem:[%s2450_s4 + $0x10] sm:$0xff]  ;;  %v506_v25 = vld.sshfl [vmem:[#allocation1 + $0x8] sm:$0xff pattern:$0x75316420]  ;;  %v1328_v27 = vld [vmem:[%s2447_s1 + $0x180] sm:$0xff] }
  0x2f   : > { %295 = vmatpush.msra.mxu1 %v242_v30  ;;  %511 = vmatpush.msrb.mxu3 %v1325_v54  ;;  %v1329_v26 = vld [vmem:[%s2447_s1 + $0x188] sm:$0xff]  ;;  %v365_v28 = vld [vmem:[%s2450_s4 + $0x18] sm:$0xff]  ;;  %v1361_v52 = vld [vmem:[%s2448_s2 + $0x90] sm:$0xf] }
  0x30   : > { %276 = vmatpush.msra.mxu0 %v225_v31  ;;  %378 = vperm.xlu1 %1557, %v364_v22   ;;  %v1362_v53 = vld [vmem:[%s2448_s2 + $0x98] sm:$0xf]  ;;  %v1359_v54 = vld [vmem:[%s2448_s2 + $0x80] sm:$0xff]  ;;  %v1346_v1 = vld [vmem:[%s2449_s3 + $0x30] sm:$0xff] }
  0x31   : > { %296 = vmatpush.msra.mxu1 %v241_v32  ;;  %512 = vmatpush.msrb.mxu3 %v1324_v55  ;;  %v1360_v55 = vld [vmem:[%s2448_s2 + $0x88] sm:$0xff]  ;;  %v1347_v2 = vld [vmem:[%s2449_s3 + $0x38] sm:$0xff]  ;;  %v1399_v22 = vld [vmem:[%s2447_s1 + $0x2b0] sm:$0xff] }
  0x32   : > { %277 = vmatpush.msra.mxu0 %v224_v33  ;;  %373 = vperm.xlu0 %1556, %v363_v11   ;;  %v1404_v11 = vld [vmem:[%s2447_s1 + $0x2d8] sm:$0xff] }
  0x33   : > { %297 = vmatpush.msra.mxu1 %v240_v34  ;;  %278 = vmatmul.f32.vlgmr.msra.gmra.mxu0 %v258_v23  ;;  %v1330_v23 = vld [vmem:[%s2447_s1 + $0x190] sm:$0xff] }
  0x34   : > { %298 = vmatmul.f32.vlgmr.msra.gmra.mxu1 %v259_v24  ;;  %529 = vmatpush.msrb.mxu0 %v1343_v56  ;;  %v505_v24 = vld.sshfl [vmem:[#allocation1] sm:$0xff pattern:$0x75316420] }
  0x35   : > { %513 = vmatpush.msrb.mxu3 %v1323_v57  ;;  %751 = vst [vmem:[#allocation1] ss:$2 sm:$0xff] %v1751_v14  ;;  %v1357_v57 = vld [vmem:[%s2448_s2 + $0x70] sm:$0xff] }
  0x36   : > { %530 = vmatpush.msrb.mxu0 %v1342_v58  ;;  %v1358_v58 = vld [vmem:[%s2448_s2 + $0x78] sm:$0xff] }
  0x37   : > { %514 = vmatpush.msrb.mxu3 %v1322_v59 }
  0x38   : > { %531 = vmatpush.msrb.mxu0 %v1341_v60  ;;  %383 = vperm.xlu1 %1557, %v365_v28   ;;  %v1355_v60 = vld [vmem:[%s2448_s2 + $0x60] sm:$0xff]  ;;  %v1396_v28 = vld [vmem:[%s2447_s1 + $0x298] sm:$0xff] }
  0x39   : > { %515 = vmatpush.msrb.mxu3 %v1321_v61 }
  0x3a   : > { %532 = vmatpush.msrb.mxu0 %v1340_v62  ;;  %v1344_v62 = vld [vmem:[%s2449_s3 + $0x20] sm:$0xff] }
  0x3b   : > { %516 = vmatpush.msrb.mxu3 %v1320_v63  ;;  %v1356_v63 = vld [vmem:[%s2448_s2 + $0x68] sm:$0xff] }
  0x3c   : > { %533 = vmatpush.msrb.mxu0 %v1339_v0  ;;  %v1345_v0 = vld [vmem:[%s2449_s3 + $0x28] sm:$0xff] }
  0x3d   : > { %517 = vmatpush.msrb.mxu3 %v1319_v3  ;;  %v1353_v3 = vld [vmem:[%s2448_s2 + $0x50] sm:$0xff] }
  0x3e   : > { %534 = vmatpush.msrb.mxu0 %v1338_v4  ;;  %v1354_v4 = vld [vmem:[%s2448_s2 + $0x58] sm:$0xff] }
  0x3f   : > { %518 = vmatpush.msrb.mxu3 %v1318_v5  ;;  %v1408_v5 = vld [vmem:[%s2447_s1 + $0x2f8] sm:$0xff] }
  0x40   : > { %535 = vmatpush.msrb.mxu0 %v1337_v6  ;;  %v1407_v6 = vld [vmem:[%s2447_s1 + $0x2f0] sm:$0xff] }
  0x41   : > { %519 = vmatpush.msrb.mxu3 %v1317_v7  ;;  %v1406_v7 = vld [vmem:[%s2447_s1 + $0x2e8] sm:$0xff] }
  0x42   : > { %536 = vmatpush.msrb.mxu0 %v1336_v8  ;;  %v1392_v8 = vld [vmem:[%s2447_s1 + $0x278] sm:$0xff] }
  0x43   : > { %520 = vmatpush.msrb.mxu3 %v1316_v9  ;;  %v1405_v9 = vld [vmem:[%s2447_s1 + $0x2e0] sm:$0xff] }
  0x44   : > { %537 = vmatpush.msrb.mxu0 %v1335_v10  ;;  %v1391_v10 = vld [vmem:[%s2447_s1 + $0x270] sm:$0xff] }
  0x45   : > { %521 = vmatpush.msrb.mxu3 %v1315_v12  ;;  %v1390_v12 = vld [vmem:[%s2447_s1 + $0x268] sm:$0xff] }
  0x46   : > { %538 = vmatpush.msrb.mxu0 %v1334_v13  ;;  %v1403_v13 = vld [vmem:[%s2447_s1 + $0x2d0] sm:$0xff] }
  0x47   : > { %522 = vmatpush.msrb.mxu3 %v1314_v15  ;;  %v1389_v15 = vld [vmem:[%s2447_s1 + $0x260] sm:$0xff] }
  0x48   : > { %539 = vmatpush.msrb.mxu0 %v1333_v16  ;;  %v1402_v16 = vld [vmem:[%s2447_s1 + $0x2c8] sm:$0xff] }
  0x49   : > { %523 = vmatpush.msrb.mxu3 %v1313_v17  ;;  %v1388_v17 = vld [vmem:[%s2447_s1 + $0x258] sm:$0xff] }
  0x4a   : > { %540 = vmatpush.msrb.mxu0 %v1332_v18  ;;  %v1401_v18 = vld [vmem:[%s2447_s1 + $0x2c0] sm:$0xff] }
  0x4b   : > { %524 = vmatpush.msrb.mxu3 %v1312_v19  ;;  %v1387_v19 = vld [vmem:[%s2447_s1 + $0x250] sm:$0xff] }
  0x4c   : > { %541 = vmatpush.msrb.mxu0 %v1331_v20  ;;  %v1400_v20 = vld [vmem:[%s2447_s1 + $0x2b8] sm:$0xff] }
  0x4e   : > { %542 = vmatpush.msrb.mxu0 %v1330_v23  ;;  %v1385_v23 = vld [vmem:[%s2447_s1 + $0x240] sm:$0xff] }
  0x50   : > { %543 = vmatpush.msrb.mxu0 %v1329_v26  ;;  %v1397_v26 = vld [vmem:[%s2447_s1 + $0x2a0] sm:$0xff] }
  0x52   : > { %544 = vmatpush.msrb.mxu0 %v1328_v27  ;;  %v1383_v27 = vld [vmem:[%s2447_s1 + $0x230] sm:$0xff] }
  0x53   : > { %545 = vmatmul.f32.vlgmr.msrb.gmra.mxu0 %v506_v25  ;;  %v1384_v25 = vld [vmem:[%s2447_s1 + $0x238] sm:$0xff] }
  0x9c   : > { %v369_v32 = vpop.permute.xlu0 %368 }
  0xa4   : > { %v374_v37 = vpop.permute.xlu0 %373 }
  0xb0   : > { %v279_v38 = vpop.f32.mrf.mxu0 }
  0xb1   : > { %v299_v39 = vpop.f32.mrf.mxu1 }
  0xb2   : > { %v300_v41 = vadd.f32 %v299_v39, %v279_v38 }
  0xb4   : > { %1297 = vmatpush.msk.msra.mxu2 %vm319_vm0, %v300_v41 }
  0xb5   : > { %1298 = vmatmul.msk.f32.vlgmr.msra.gmra.mxu2 %vm306_vm1, %v302_v42  ;;  %v379_v42 = vpop.permute.xlu1 %378 }
  0xb6   : > { %1307 = vmatpush.msk.msrb.mxu2 %vm319_vm0, %v361_v43 }
  0xb8   : > { %446 = vmatpush.msrb.mxu2 %v359_v44 }
  0xba   : > { %447 = vmatpush.msrb.mxu2 %v357_v45 }
  0xbc   : > { %448 = vmatpush.msrb.mxu2 %v355_v46 }
  0xbd   : > { %1299 = vmatmul.msk.f32.gmra.mxu2 %vm306_vm1, %v303_v47  ;;  %v384_v47 = vpop.permute.xlu1 %383 }
  0xbe   : > { %449 = vmatpush.msrb.mxu2 %v353_v51 }
  0xc0   : > { %1372 = vmatpush.msk.msra.mxu2 %vm319_vm0, %v1362_v53 }
  0xc2   : > { %693 = vmatpush.msra.mxu2 %v1360_v55 }
  0xc4   : > { %694 = vmatpush.msra.mxu2 %v1358_v58 }
  0xc5   : > { %1300 = vmatmul.msk.f32.gmra.mxu2 %vm306_vm1, %v304_v48 }
  0xc6   : > { %695 = vmatpush.msra.mxu2 %v1356_v63 }
  0xc8   : > { %696 = vmatpush.msra.mxu2 %v1354_v4  ;;  %v1427_v4 = vld [vmem:[%s2448_s2 + $0xe8] sm:$0xf] }
  0xcd   : > { %1301 = vmatmul.msk.f32.gmra.mxu2 %vm306_vm1, %v305_v49 }
  0xd0   : > { %v546_v56 = vpop.f32.mrf.mxu0 }
 0x138   : > { %v340_v21 = vpop.f32.mrf.mxu2 }
 0x139   : > { %1303 = vmatmul.msk.f32.vlgmr.msra.gmra.mxu3 %vm386_vm2, %v340_v21  ;;  %1308 = vmatmul.msk.f32.vlgmr.msrb.gmra.mxu2 %vm386_vm2, %v340_v21  ;;  %v1386_v21 = vld [vmem:[%s2447_s1 + $0x248] sm:$0xff] }
 0x13a   : > { %1367 = vmatpush.msk.msra.mxu3 %vm319_vm0, %v1361_v52 }
 0x13c   : > { %664 = vmatpush.msra.mxu3 %v1359_v54 }
 0x13e   : > { %665 = vmatpush.msra.mxu3 %v1357_v57 }
 0x140   : > { %v343_v29 = vpop.f32.mrf.mxu2  ;;  %666 = vmatpush.msra.mxu3 %v1355_v60 }
 0x141   : > { %1304 = vmatmul.msk.f32.gmra.mxu3 %vm386_vm2, %v343_v29  ;;  %1309 = vmatmul.msk.f32.gmra.mxu2 %vm386_vm2, %v343_v29  ;;  %v1382_v29 = vld [vmem:[%s2447_s1 + $0x228] sm:$0xff] }
 0x142   : > { %667 = vmatpush.msra.mxu3 %v1353_v3  ;;  %v1426_v3 = vld [vmem:[%s2448_s2 + $0xe0] sm:$0xf] }
 0x148   : > { %v346_v30 = vpop.f32.mrf.mxu2 }
 0x149   : > { %1305 = vmatmul.msk.f32.gmra.mxu3 %vm386_vm2, %v346_v30  ;;  %1310 = vmatmul.msk.f32.gmra.mxu2 %vm386_vm2, %v346_v30  ;;  %v1395_v30 = vld [vmem:[%s2447_s1 + $0x290] sm:$0xff] }
 0x150   : > { %v349_v31 = vpop.f32.mrf.mxu2 }
 0x151   : > { %1306 = vmatmul.msk.f32.gmra.mxu3 %vm386_vm2, %v349_v31  ;;  %1311 = vmatmul.msk.f32.gmra.mxu2 %vm386_vm2, %v349_v31  ;;  %v1381_v31 = vld [vmem:[%s2447_s1 + $0x220] sm:$0xff] }
 0x159   : > { %525 = vmatmul.f32.vlgmr.msrb.gmra.mxu3 %v505_v24  ;;  %v1398_v24 = vld [vmem:[%s2447_s1 + $0x2a8] sm:$0xff] }
 0x15a   : > { %776 = vmatpush.msrb.mxu3 %v1408_v5  ;;  %v1424_v5 = vld [vmem:[%s2448_s2 + $0xd0] sm:$0xff] }
 0x15c   : > { %777 = vmatpush.msrb.mxu3 %v1407_v6  ;;  %v1425_v6 = vld [vmem:[%s2448_s2 + $0xd8] sm:$0xff] }
 0x15e   : > { %778 = vmatpush.msrb.mxu3 %v1406_v7 }
 0x160   : > { %779 = vmatpush.msrb.mxu3 %v1405_v9  ;;  %v1423_v9 = vld [vmem:[%s2448_s2 + $0xc8] sm:$0xff] }
 0x162   : > { %780 = vmatpush.msrb.mxu3 %v1404_v11  ;;  %v1420_v11 = vld [vmem:[%s2448_s2 + $0xb0] sm:$0xff] }
 0x164   : > { %781 = vmatpush.msrb.mxu3 %v1403_v13  ;;  %v1409_v13 = vld [vmem:[%s2449_s3 + $0x40] sm:$0xff] }
 0x166   : > { %782 = vmatpush.msrb.mxu3 %v1402_v16  ;;  %v1410_v16 = vld [vmem:[%s2449_s3 + $0x48] sm:$0xff] }
 0x168   : > { %783 = vmatpush.msrb.mxu3 %v1401_v18  ;;  %v1412_v18 = vld [vmem:[%s2449_s3 + $0x58] sm:$0xff] }
 0x16a   : > { %784 = vmatpush.msrb.mxu3 %v1400_v20  ;;  %v1419_v20 = vld [vmem:[%s2448_s2 + $0xa8] sm:$0xff] }
 0x16c   : > { %785 = vmatpush.msrb.mxu3 %v1399_v22  ;;  %v1473_v22 = vld [vmem:[%s2447_s1 + $0x3f8] sm:$0xff] }
 0x16e   : > { %786 = vmatpush.msrb.mxu3 %v1398_v24  ;;  %v1472_v24 = vld [vmem:[%s2447_s1 + $0x3f0] sm:$0xff] }
 0x170   : > { %787 = vmatpush.msrb.mxu3 %v1397_v26  ;;  %v1471_v26 = vld [vmem:[%s2447_s1 + $0x3e8] sm:$0xff] }
 0x172   : > { %788 = vmatpush.msrb.mxu3 %v1396_v28  ;;  %v1470_v28 = vld [vmem:[%s2447_s1 + $0x3e0] sm:$0xff] }
 0x174   : > { %789 = vmatpush.msrb.mxu3 %v1395_v30  ;;  %v1469_v30 = vld [vmem:[%s2447_s1 + $0x3d8] sm:$0xff] }
 0x1bc   : > { %v422_v33 = vpop.f32.mrf.mxu3  ;;  %v451_v34 = vpop.f32.mrf.mxu2 }
 0x1bd   : > { %v423_v35 = vadd.f32 %v422_v33, %v369_v32  ;;  %v452_v36 = vadd.f32 %v451_v34, %v369_v32  ;;  %v1394_v32 = vld [vmem:[%s2447_s1 + $0x288] sm:$0xff]  ;;  %v1380_v33 = vld [vmem:[%s2447_s1 + $0x218] sm:$0xff]  ;;  %v1393_v34 = vld [vmem:[%s2447_s1 + $0x280] sm:$0xff] }
 0x1be   : > { %790 = vmatpush.msrb.mxu3 %v1394_v32  ;;  %v1468_v32 = vld [vmem:[%s2447_s1 + $0x3d0] sm:$0xff] }
 0x1bf   : > { %463 = vst [vmem:[%s1978_s16] sm:$0xff] %v423_v35 }
 0x1c0   : > { %464 = vst [vmem:[%s1978_s16 + $0x8] sm:$0xff] %v452_v36  ;;  %v753_v36 = vld.sshfl [vmem:[#allocation1 + $0x8] sm:$0xff pattern:$0x75316420]  ;;  %791 = vmatpush.msrb.mxu3 %v1393_v34 }
 0x1c1   : > { %v1467_v34 = vld [vmem:[%s2447_s1 + $0x3c8] sm:$0xff] }
 0x1c4   : > { %v425_v38 = vpop.f32.mrf.mxu3  ;;  %v454_v39 = vpop.f32.mrf.mxu2 }
 0x1c5   : > { %v426_v40 = vadd.f32 %v425_v38, %v374_v37  ;;  %v455_v41 = vadd.f32 %v454_v39, %v374_v37  ;;  %v1365_v37 = vld [vmem:[%s2450_s4 + $0x30] sm:$0xff]  ;;  %v752_v39 = vld.sshfl [vmem:[#allocation1] sm:$0xff pattern:$0x75316420] }
 0x1c6   : > { %v1379_v38 = vld [vmem:[%s2447_s1 + $0x210] sm:$0xff]  ;;  %626 = vperm.xlu0 %1556, %v1365_v37   ;;  %998 = vst [vmem:[#allocation1] ss:$2 sm:$0xff] %v1751_v14  ;;  %v1449_v37 = vld [vmem:[%s2447_s1 + $0x338] sm:$0xff] }
 0x1c7   : > { %465 = vst [vmem:[%s1978_s16 + $0x10] sm:$0xff] %v426_v40  ;;  %v1363_v40 = vld [vmem:[%s2450_s4 + $0x20] sm:$0xff] }
 0x1c8   : > { %466 = vst [vmem:[%s1978_s16 + $0x18] sm:$0xff] %v455_v41  ;;  %v1378_v41 = vld [vmem:[%s2447_s1 + $0x208] sm:$0xff]  ;;  %616 = vperm.xlu2 %1558, %v1363_v40   ;;  %v1448_v40 = vld [vmem:[%s2447_s1 + $0x330] sm:$0xff] }
 0x1cc   : > { %v428_v43 = vpop.f32.mrf.mxu3  ;;  %v457_v44 = vpop.f32.mrf.mxu2 }
 0x1cd   : > { %v429_v45 = vadd.f32 %v428_v43, %v379_v42  ;;  %v458_v46 = vadd.f32 %v457_v44, %v379_v42  ;;  %v1366_v42 = vld [vmem:[%s2450_s4 + $0x38] sm:$0xff]  ;;  %v1377_v43 = vld [vmem:[%s2447_s1 + $0x200] sm:$0xff] }
 0x1ce   : > { %631 = vperm.xlu1 %1557, %v1366_v42   ;;  %v1447_v42 = vld [vmem:[%s2447_s1 + $0x328] sm:$0xff] }
 0x1cf   : > { %467 = vst [vmem:[%s1978_s16 + $0x20] sm:$0xff] %v429_v45  ;;  %v1364_v45 = vld [vmem:[%s2450_s4 + $0x28] sm:$0xff] }
 0x1d0   : > { %468 = vst [vmem:[%s1978_s16 + $0x28] sm:$0xff] %v458_v46  ;;  %621 = vperm.xlu2 %1558, %v1364_v45   ;;  %v1462_v45 = vld [vmem:[%s2447_s1 + $0x3a0] sm:$0xff] }
 0x1d4   : > { %v431_v48 = vpop.f32.mrf.mxu3  ;;  %v460_v49 = vpop.f32.mrf.mxu2 }
 0x1d5   : > { %v432_v50 = vadd.f32 %v431_v48, %v384_v47  ;;  %v461_v51 = vadd.f32 %v460_v49, %v384_v47 }
 0x1d7   : > { %469 = vst [vmem:[%s1978_s16 + $0x30] sm:$0xff] %v432_v50 }
 0x1d8   : > { %470 = vst [vmem:[%s1978_s16 + $0x38] sm:$0xff] %v461_v51 }
 0x1dc   : > { %v526_v59 = vpop.f32.mrf.mxu3 }
 0x1dd   : > { %v547_v61 = vadd.f32 %v546_v56, %v526_v59 }
 0x1df   : > { %1348 = vmatpush.msk.msrb.mxu1 %vm319_vm0, %v547_v61 }
 0x1e0   : > { %1349 = vmatmul.msk.f32.vlgmr.msrb.gmra.mxu1 %vm306_vm1, %v1344_v62 }
 0x1e1   : > { %756 = vmatpush.msra.mxu1 %v1392_v8  ;;  %v1422_v8 = vld [vmem:[%s2448_s2 + $0xc0] sm:$0xff] }
 0x1e3   : > { %757 = vmatpush.msra.mxu1 %v1391_v10 }
 0x1e5   : > { %758 = vmatpush.msra.mxu1 %v1390_v12 }
 0x1e7   : > { %759 = vmatpush.msra.mxu1 %v1389_v15  ;;  %v1421_v15 = vld [vmem:[%s2448_s2 + $0xb8] sm:$0xff] }
 0x1e8   : > { %1350 = vmatmul.msk.f32.gmra.mxu1 %vm306_vm1, %v1345_v0 }
 0x1e9   : > { %760 = vmatpush.msra.mxu1 %v1388_v17  ;;  %v1411_v17 = vld [vmem:[%s2449_s3 + $0x50] sm:$0xff] }
 0x1eb   : > { %761 = vmatpush.msra.mxu1 %v1387_v19  ;;  %v1418_v19 = vld [vmem:[%s2448_s2 + $0xa0] sm:$0xff] }
 0x1ed   : > { %762 = vmatpush.msra.mxu1 %v1386_v21  ;;  %v1457_v21 = vld [vmem:[%s2447_s1 + $0x378] sm:$0xff] }
 0x1ee   : > { %1003 = vmatpush.msrb.mxu2 %v1457_v21  ;;  %v1489_v21 = vld [vmem:[%s2448_s2 + $0x120] sm:$0xff] }
 0x1ef   : > { %763 = vmatpush.msra.mxu1 %v1385_v23  ;;  %v1456_v23 = vld [vmem:[%s2447_s1 + $0x370] sm:$0xff] }
 0x1f0   : > { %1351 = vmatmul.msk.f32.gmra.mxu1 %vm306_vm1, %v1346_v1  ;;  %1004 = vmatpush.msrb.mxu2 %v1456_v23 }
 0x1f1   : > { %764 = vmatpush.msra.mxu1 %v1384_v25  ;;  %v1455_v25 = vld [vmem:[%s2447_s1 + $0x368] sm:$0xff] }
 0x1f2   : > { %1005 = vmatpush.msrb.mxu2 %v1455_v25  ;;  %v1488_v25 = vld [vmem:[%s2448_s2 + $0x118] sm:$0xff] }
 0x1f3   : > { %765 = vmatpush.msra.mxu1 %v1383_v27  ;;  %v1454_v27 = vld [vmem:[%s2447_s1 + $0x360] sm:$0xff] }
 0x1f4   : > { %1006 = vmatpush.msrb.mxu2 %v1454_v27 }
 0x1f5   : > { %766 = vmatpush.msra.mxu1 %v1382_v29  ;;  %v1453_v29 = vld [vmem:[%s2447_s1 + $0x358] sm:$0xff] }
 0x1f6   : > { %1007 = vmatpush.msrb.mxu2 %v1453_v29 }
 0x1f7   : > { %767 = vmatpush.msra.mxu1 %v1381_v31  ;;  %v1452_v31 = vld [vmem:[%s2447_s1 + $0x350] sm:$0xff] }
 0x1f8   : > { %1352 = vmatmul.msk.f32.gmra.mxu1 %vm306_vm1, %v1347_v2  ;;  %1008 = vmatpush.msrb.mxu2 %v1452_v31  ;;  %v1486_v31 = vld [vmem:[%s2448_s2 + $0x108] sm:$0xff] }
 0x1f9   : > { %768 = vmatpush.msra.mxu1 %v1380_v33  ;;  %v1451_v33 = vld [vmem:[%s2447_s1 + $0x348] sm:$0xff] }
 0x1fa   : > { %1009 = vmatpush.msrb.mxu2 %v1451_v33  ;;  %v1476_v33 = vld [vmem:[%s2449_s3 + $0x70] sm:$0xff] }
 0x1fb   : > { %769 = vmatpush.msra.mxu1 %v1379_v38  ;;  %v1465_v38 = vld [vmem:[%s2447_s1 + $0x3b8] sm:$0xff] }
 0x1fd   : > { %770 = vmatpush.msra.mxu1 %v1378_v41  ;;  %v1464_v41 = vld [vmem:[%s2447_s1 + $0x3b0] sm:$0xff] }
 0x1ff   : > { %771 = vmatpush.msra.mxu1 %v1377_v43  ;;  %v1463_v43 = vld [vmem:[%s2447_s1 + $0x3a8] sm:$0xff] }
 0x200   : > { %772 = vmatmul.f32.vlgmr.msra.gmra.mxu1 %v752_v39  ;;  %v1429_v39 = vld [vmem:[%s2450_s4 + $0x48] sm:$0xff] }
 0x201   : > { %1432 = vmatpush.msk.msrb.mxu1 %vm319_vm0, %v1426_v3  ;;  %868 = vperm.xlu0 %1556, %v1429_v39   ;;  %v1495_v39 = vld [vmem:[%s2450_s4 + $0x70] sm:$0xff] }
 0x203   : > { %911 = vmatpush.msrb.mxu1 %v1424_v5 }
 0x205   : > { %912 = vmatpush.msrb.mxu1 %v1422_v8 }
 0x207   : > { %913 = vmatpush.msrb.mxu1 %v1420_v11 }
 0x209   : > { %914 = vmatpush.msrb.mxu1 %v1418_v19  ;;  %v1491_v19 = vld [vmem:[%s2448_s2 + $0x130] sm:$0xf] }
 0x222   : > { %v617_v47 = vpop.permute.xlu2 %616 }
 0x22a   : > { %v622_v52 = vpop.permute.xlu2 %621 }
 0x238   : > { %v627_v57 = vpop.permute.xlu0 %626 }
 0x240   : > { %v632_v62 = vpop.permute.xlu1 %631 }
 0x25d   : > { %v586_v35 = vpop.f32.mrf.mxu1 }
 0x25e   : > { %1368 = vmatmul.msk.f32.vlgmr.msra.gmra.mxu3 %vm386_vm2, %v586_v35  ;;  %1373 = vmatmul.msk.f32.vlgmr.msra.gmra.mxu2 %vm386_vm2, %v586_v35  ;;  %v1450_v35 = vld [vmem:[%s2447_s1 + $0x340] sm:$0xff] }
 0x25f   : > { %1437 = vmatpush.msk.msra.mxu3 %vm319_vm0, %v1427_v4  ;;  %1010 = vmatpush.msrb.mxu2 %v1450_v35  ;;  %v1496_v35 = vld [vmem:[%s2450_s4 + $0x78] sm:$0xff] }
 0x261   : > { %940 = vmatpush.msra.mxu3 %v1425_v6  ;;  %1011 = vmatpush.msrb.mxu2 %v1449_v37  ;;  %v1484_v37 = vld [vmem:[%s2448_s2 + $0xf8] sm:$0xff] }
 0x263   : > { %941 = vmatpush.msra.mxu3 %v1423_v9  ;;  %1012 = vmatpush.msrb.mxu2 %v1448_v40 }
 0x265   : > { %v589_v44 = vpop.f32.mrf.mxu1  ;;  %942 = vmatpush.msra.mxu3 %v1421_v15  ;;  %1013 = vmatpush.msrb.mxu2 %v1447_v42 }
 0x266   : > { %1369 = vmatmul.msk.f32.gmra.mxu3 %vm386_vm2, %v589_v44  ;;  %1374 = vmatmul.msk.f32.gmra.mxu2 %vm386_vm2, %v589_v44  ;;  %v1446_v44 = vld [vmem:[%s2447_s1 + $0x320] sm:$0xff] }
 0x267   : > { %943 = vmatpush.msra.mxu3 %v1419_v20  ;;  %1014 = vmatpush.msrb.mxu2 %v1446_v44  ;;  %v1492_v20 = vld [vmem:[%s2448_s2 + $0x138] sm:$0xf] }
 0x268   : > { %1502 = vmatpush.msk.msra.mxu1 %vm319_vm0, %v1492_v20 }
 0x26d   : > { %v592_v14 = vpop.f32.mrf.mxu1 }
 0x26e   : > { %1370 = vmatmul.msk.f32.gmra.mxu3 %vm386_vm2, %v592_v14  ;;  %1375 = vmatmul.msk.f32.gmra.mxu2 %vm386_vm2, %v592_v14  ;;  %v1445_v14 = vld [vmem:[%s2447_s1 + $0x318] sm:$0xff] }
 0x26f   : > { %1015 = vmatpush.msrb.mxu2 %v1445_v14 }
 0x275   : > { %v595_v46 = vpop.f32.mrf.mxu1 }
 0x276   : > { %1371 = vmatmul.msk.f32.gmra.mxu3 %vm386_vm2, %v595_v46  ;;  %1376 = vmatmul.msk.f32.gmra.mxu2 %vm386_vm2, %v595_v46  ;;  %v1461_v46 = vld [vmem:[%s2447_s1 + $0x398] sm:$0xff] }
 0x27d   : > { %v773_v7 = vpop.f32.mrf.mxu1 }
 0x27e   : > { %792 = vmatmul.f32.vlgmr.msrb.gmra.mxu3 %v753_v36  ;;  %v1466_v36 = vld [vmem:[%s2447_s1 + $0x3c0] sm:$0xff] }
 0x27f   : > { %1023 = vmatpush.msrb.mxu3 %v1473_v22  ;;  %v1490_v22 = vld [vmem:[%s2448_s2 + $0x128] sm:$0xff] }
 0x280   : > { %1187 = vmatpush.msra.mxu1 %v1490_v22 }
 0x281   : > { %1024 = vmatpush.msrb.mxu3 %v1472_v24  ;;  %v1487_v24 = vld [vmem:[%s2448_s2 + $0x110] sm:$0xff] }
 0x282   : > { %1188 = vmatpush.msra.mxu1 %v1488_v25 }
 0x283   : > { %1025 = vmatpush.msrb.mxu3 %v1471_v26  ;;  %v1493_v26 = vld [vmem:[%s2450_s4 + $0x60] sm:$0xff] }
 0x284   : > { %1110 = vperm.xlu0 %1556, %v1493_v26   ;;  %1189 = vmatpush.msra.mxu1 %v1486_v31 }
 0x285   : > { %1026 = vmatpush.msrb.mxu3 %v1470_v28  ;;  %v1485_v28 = vld [vmem:[%s2448_s2 + $0x100] sm:$0xff] }
 0x286   : > { %1190 = vmatpush.msra.mxu1 %v1484_v37 }
 0x287   : > { %1027 = vmatpush.msrb.mxu3 %v1469_v30  ;;  %v1474_v30 = vld [vmem:[%s2449_s3 + $0x60] sm:$0xff] }
 0x289   : > { %1028 = vmatpush.msrb.mxu3 %v1468_v32  ;;  %v1475_v32 = vld [vmem:[%s2449_s3 + $0x68] sm:$0xff] }
 0x28b   : > { %1029 = vmatpush.msrb.mxu3 %v1467_v34  ;;  %v1477_v34 = vld [vmem:[%s2449_s3 + $0x78] sm:$0xff] }
 0x28c   : > { %1125 = vperm.xlu0 %1556, %v1496_v35  }
 0x28d   : > { %1030 = vmatpush.msrb.mxu3 %v1466_v36  ;;  %v1483_v36 = vld [vmem:[%s2448_s2 + $0xf0] sm:$0xff] }
 0x28f   : > { %1031 = vmatpush.msrb.mxu3 %v1465_v38  ;;  %v1494_v38 = vld [vmem:[%s2450_s4 + $0x68] sm:$0xff] }
 0x291   : > { %1032 = vmatpush.msrb.mxu3 %v1464_v41 }
 0x293   : > { %1033 = vmatpush.msrb.mxu3 %v1463_v43 }
 0x295   : > { %1034 = vmatpush.msrb.mxu3 %v1462_v45 }
 0x297   : > { %1035 = vmatpush.msrb.mxu3 %v1461_v46 }
 0x2e1   : > { %v669_v48 = vpop.f32.mrf.mxu3  ;;  %v698_v49 = vpop.f32.mrf.mxu2 }
 0x2e2   : > { %v670_v50 = vadd.f32 %v669_v48, %v617_v47  ;;  %v699_v51 = vadd.f32 %v698_v49, %v617_v47  ;;  %v1430_v47 = vld [vmem:[%s2450_s4 + $0x50] sm:$0xff] }
 0x2e3   : > { %873 = vperm.xlu1 %1557, %v1430_v47   ;;  %v1444_v48 = vld [vmem:[%s2447_s1 + $0x310] sm:$0xff] }
 0x2e4   : > { %710 = vst [vmem:[%s1978_s16 + $0x40] sm:$0xff] %v670_v50  ;;  %v1460_v49 = vld [vmem:[%s2447_s1 + $0x390] sm:$0xff]  ;;  %v1443_v50 = vld [vmem:[%s2447_s1 + $0x308] sm:$0xff]  ;;  %1016 = vmatpush.msrb.mxu2 %v1444_v48 }
 0x2e5   : > { %711 = vst [vmem:[%s1978_s16 + $0x48] sm:$0xff] %v699_v51  ;;  %v1459_v51 = vld [vmem:[%s2447_s1 + $0x388] sm:$0xff]  ;;  %1036 = vmatpush.msrb.mxu3 %v1460_v49 }
 0x2e6   : > { %1017 = vmatpush.msrb.mxu2 %v1443_v50 }
 0x2e7   : > { %1037 = vmatpush.msrb.mxu3 %v1459_v51 }
 0x2e9   : > { %v672_v53 = vpop.f32.mrf.mxu3  ;;  %v701_v54 = vpop.f32.mrf.mxu2 }
 0x2ea   : > { %v673_v55 = vadd.f32 %v672_v53, %v622_v52  ;;  %v702_v56 = vadd.f32 %v701_v54, %v622_v52  ;;  %v1442_v52 = vld [vmem:[%s2447_s1 + $0x300] sm:$0xff] }
 0x2eb   : > { %v1458_v53 = vld [vmem:[%s2447_s1 + $0x380] sm:$0xff]  ;;  %1018 = vmatpush.msrb.mxu2 %v1442_v52  ;;  %1115 = vperm.xlu1 %1557, %v1494_v38  }
 0x2ec   : > { %712 = vst [vmem:[%s1978_s16 + $0x50] sm:$0xff] %v673_v55  ;;  %v999_v55 = vld.sshfl [vmem:[#allocation1] sm:$0xff pattern:$0x75316420]  ;;  %1038 = vmatpush.msrb.mxu3 %v1458_v53 }
 0x2ed   : > { %713 = vst [vmem:[%s1978_s16 + $0x58] sm:$0xff] %v702_v56  ;;  %v1428_v56 = vld [vmem:[%s2450_s4 + $0x40] sm:$0xff]  ;;  %1019 = vmatmul.f32.vlgmr.msrb.gmra.mxu2 %v999_v55 }
 0x2ee   : > { %863 = vperm.xlu2 %1558, %v1428_v56  }
 0x2f1   : > { %v675_v58 = vpop.f32.mrf.mxu3  ;;  %v704_v59 = vpop.f32.mrf.mxu2 }
 0x2f2   : > { %v676_v60 = vadd.f32 %v675_v58, %v627_v57  ;;  %v705_v61 = vadd.f32 %v704_v59, %v627_v57  ;;  %v1431_v58 = vld [vmem:[%s2450_s4 + $0x58] sm:$0xff] }
 0x2f4   : > { %714 = vst [vmem:[%s1978_s16 + $0x60] sm:$0xff] %v676_v60 }
 0x2f5   : > { %715 = vst [vmem:[%s1978_s16 + $0x68] sm:$0xff] %v705_v61  ;;  %v1000_v61 = vld.sshfl [vmem:[#allocation1 + $0x8] sm:$0xff pattern:$0x75316420] }
 0x2f6   : > { %878 = vperm.xlu2 %1558, %v1431_v58  }
 0x2f9   : > { %v678_v63 = vpop.f32.mrf.mxu3  ;;  %v707_v0 = vpop.f32.mrf.mxu2 }
 0x2fa   : > { %v679_v1 = vadd.f32 %v678_v63, %v632_v62  ;;  %v708_v2 = vadd.f32 %v707_v0, %v632_v62 }
 0x2fc   : > { %716 = vst [vmem:[%s1978_s16 + $0x70] sm:$0xff] %v679_v1 }
 0x2fd   : > { %717 = vst [vmem:[%s1978_s16 + $0x78] sm:$0xff] %v708_v2  ;;  %v869_v2 = vpop.permute.xlu0 %868 }
 0x2fe   : > { %1120 = vperm.xlu2 %1558, %v1495_v39  }
 0x301   : > { %v793_v10 = vpop.f32.mrf.mxu3 }
 0x302   : > { %v794_v12 = vadd.f32 %v793_v10, %v773_v7 }
 0x304   : > { %1413 = vmatpush.msk.msra.mxu0 %vm319_vm0, %v794_v12 }
 0x305   : > { %1414 = vmatmul.msk.f32.vlgmr.msra.gmra.mxu0 %vm306_vm1, %v1409_v13  ;;  %v1111_v44 = vpop.permute.xlu0 %1110 }
 0x306   : > { %1497 = vmatpush.msk.msrb.mxu0 %vm319_vm0, %v1491_v19 }
 0x308   : > { %1158 = vmatpush.msrb.mxu0 %v1489_v21 }
 0x30a   : > { %1159 = vmatpush.msrb.mxu0 %v1487_v24 }
 0x30c   : > { %1160 = vmatpush.msrb.mxu0 %v1485_v28 }
 0x30d   : > { %1415 = vmatmul.msk.f32.gmra.mxu0 %vm306_vm1, %v1410_v16  ;;  %v1126_v58 = vpop.permute.xlu0 %1125 }
 0x30e   : > { %1161 = vmatpush.msrb.mxu0 %v1483_v36 }
 0x315   : > { %1416 = vmatmul.msk.f32.gmra.mxu0 %vm306_vm1, %v1411_v17 }
 0x31d   : > { %1417 = vmatmul.msk.f32.gmra.mxu0 %vm306_vm1, %v1412_v18 }
 0x348   : > { %v864_v62 = vpop.permute.xlu2 %863 }
 0x350   : > { %v879_v12 = vpop.permute.xlu2 %878 }
 0x355   : > { %v874_v7 = vpop.permute.xlu1 %873 }
 0x358   : > { %v1121_v53 = vpop.permute.xlu2 %1120 }
 0x35d   : > { %v1116_v48 = vpop.permute.xlu1 %1115 }
 0x370   : > { %v1020_v23 = vpop.f32.mrf.mxu2 }
 0x382   : > { %v833_v54 = vpop.f32.mrf.mxu0 }
 0x383   : > { %1433 = vmatmul.msk.f32.vlgmr.msrb.gmra.mxu1 %vm386_vm2, %v833_v54  ;;  %1438 = vmatmul.msk.f32.vlgmr.msra.gmra.mxu3 %vm386_vm2, %v833_v54 }
 0x38a   : > { %v836_v57 = vpop.f32.mrf.mxu0 }
 0x38b   : > { %1434 = vmatmul.msk.f32.gmra.mxu1 %vm386_vm2, %v836_v57  ;;  %1439 = vmatmul.msk.f32.gmra.mxu3 %vm386_vm2, %v836_v57 }
 0x392   : > { %v839_v59 = vpop.f32.mrf.mxu0 }
 0x393   : > { %1435 = vmatmul.msk.f32.gmra.mxu1 %vm386_vm2, %v839_v59  ;;  %1440 = vmatmul.msk.f32.gmra.mxu3 %vm386_vm2, %v839_v59 }
 0x39a   : > { %v842_v60 = vpop.f32.mrf.mxu0 }
 0x39b   : > { %1436 = vmatmul.msk.f32.gmra.mxu1 %vm386_vm2, %v842_v60  ;;  %1441 = vmatmul.msk.f32.gmra.mxu3 %vm386_vm2, %v842_v60 }
 0x3a3   : > { %1039 = vmatmul.f32.vlgmr.msrb.gmra.mxu3 %v1000_v61 }
 0x400   : > { %v916_v63 = vpop.f32.mrf.mxu1 }
 0x401   : > { %v917_v0 = vadd.f32 %v916_v63, %v864_v62 }
 0x403   : > { %957 = vst [vmem:[%s1978_s16 + $0x80] sm:$0xff] %v917_v0 }
 0x406   : > { %v945_v1 = vpop.f32.mrf.mxu3 }
 0x407   : > { %v946_v3 = vadd.f32 %v945_v1, %v864_v62 }
 0x408   : > { %v919_v4 = vpop.f32.mrf.mxu1 }
 0x409   : > { %958 = vst [vmem:[%s1978_s16 + $0x88] sm:$0xff] %v946_v3  ;;  %v920_v5 = vadd.f32 %v919_v4, %v869_v2 }
 0x40b   : > { %959 = vst [vmem:[%s1978_s16 + $0x90] sm:$0xff] %v920_v5 }
 0x40e   : > { %v948_v6 = vpop.f32.mrf.mxu3 }
 0x40f   : > { %v949_v8 = vadd.f32 %v948_v6, %v869_v2 }
 0x410   : > { %v922_v9 = vpop.f32.mrf.mxu1 }
 0x411   : > { %960 = vst [vmem:[%s1978_s16 + $0x98] sm:$0xff] %v949_v8  ;;  %v923_v10 = vadd.f32 %v922_v9, %v874_v7 }
 0x413   : > { %961 = vst [vmem:[%s1978_s16 + $0xa0] sm:$0xff] %v923_v10 }
 0x416   : > { %v951_v11 = vpop.f32.mrf.mxu3 }
 0x417   : > { %v952_v13 = vadd.f32 %v951_v11, %v874_v7 }
 0x418   : > { %v925_v15 = vpop.f32.mrf.mxu1 }
 0x419   : > { %962 = vst [vmem:[%s1978_s16 + $0xa8] sm:$0xff] %v952_v13  ;;  %v926_v16 = vadd.f32 %v925_v15, %v879_v12 }
 0x41b   : > { %963 = vst [vmem:[%s1978_s16 + $0xb0] sm:$0xff] %v926_v16 }
 0x41e   : > { %v954_v17 = vpop.f32.mrf.mxu3 }
 0x41f   : > { %v955_v18 = vadd.f32 %v954_v17, %v879_v12 }
 0x421   : > { %964 = vst [vmem:[%s1978_s16 + $0xb8] sm:$0xff] %v955_v18 }
 0x426   : > { %v1040_v27 = vpop.f32.mrf.mxu3 }
 0x427   : > { %v1041_v29 = vadd.f32 %v1040_v27, %v1020_v23 }
 0x429   : > { %1478 = vmatpush.msk.msra.mxu2 %vm319_vm0, %v1041_v29 }
 0x42a   : > { %1479 = vmatmul.msk.f32.vlgmr.msra.gmra.mxu2 %vm306_vm1, %v1474_v30 }
 0x432   : > { %1480 = vmatmul.msk.f32.gmra.mxu2 %vm306_vm1, %v1475_v32 }
 0x43a   : > { %1481 = vmatmul.msk.f32.gmra.mxu2 %vm306_vm1, %v1476_v33 }
 0x442   : > { %1482 = vmatmul.msk.f32.gmra.mxu2 %vm306_vm1, %v1477_v34 }
 0x4ad   : > { %v1080_v40 = vpop.f32.mrf.mxu2 }
 0x4ae   : > { %1498 = vmatmul.msk.f32.vlgmr.msrb.gmra.mxu0 %vm386_vm2, %v1080_v40  ;;  %1503 = vmatmul.msk.f32.vlgmr.msra.gmra.mxu1 %vm386_vm2, %v1080_v40 }
 0x4b5   : > { %v1083_v41 = vpop.f32.mrf.mxu2 }
 0x4b6   : > { %1499 = vmatmul.msk.f32.gmra.mxu0 %vm386_vm2, %v1083_v41  ;;  %1504 = vmatmul.msk.f32.gmra.mxu1 %vm386_vm2, %v1083_v41 }
 0x4bd   : > { %v1086_v42 = vpop.f32.mrf.mxu2 }
 0x4be   : > { %1500 = vmatmul.msk.f32.gmra.mxu0 %vm386_vm2, %v1086_v42  ;;  %1505 = vmatmul.msk.f32.gmra.mxu1 %vm386_vm2, %v1086_v42 }
 0x4c5   : > { %v1089_v43 = vpop.f32.mrf.mxu2 }
 0x4c6   : > { %1501 = vmatmul.msk.f32.gmra.mxu0 %vm386_vm2, %v1089_v43  ;;  %1506 = vmatmul.msk.f32.gmra.mxu1 %vm386_vm2, %v1089_v43 }
 0x52b   : > { %v1163_v45 = vpop.f32.mrf.mxu0  ;;  %v1192_v14 = vpop.f32.mrf.mxu1 }
 0x52c   : > { %v1164_v46 = vadd.f32 %v1163_v45, %v1111_v44  ;;  %v1193_v47 = vadd.f32 %v1192_v14, %v1111_v44 }
 0x52e   : > { %1204 = vst [vmem:[%s1978_s16 + $0xc0] sm:$0xff] %v1164_v46 }
 0x52f   : > { %1205 = vst [vmem:[%s1978_s16 + $0xc8] sm:$0xff] %v1193_v47 }
 0x533   : > { %v1166_v49 = vpop.f32.mrf.mxu0  ;;  %v1195_v50 = vpop.f32.mrf.mxu1 }
 0x534   : > { %v1167_v51 = vadd.f32 %v1166_v49, %v1116_v48  ;;  %v1196_v52 = vadd.f32 %v1195_v50, %v1116_v48 }
 0x536   : > { %1206 = vst [vmem:[%s1978_s16 + $0xd0] sm:$0xff] %v1167_v51 }
 0x537   : > { %1207 = vst [vmem:[%s1978_s16 + $0xd8] sm:$0xff] %v1196_v52 }
 0x53b   : > { %v1169_v54 = vpop.f32.mrf.mxu0  ;;  %v1198_v55 = vpop.f32.mrf.mxu1 }
 0x53c   : > { %v1170_v56 = vadd.f32 %v1169_v54, %v1121_v53  ;;  %v1199_v57 = vadd.f32 %v1198_v55, %v1121_v53 }
 0x53e   : > { %1208 = vst [vmem:[%s1978_s16 + $0xe0] sm:$0xff] %v1170_v56 }
 0x53f   : > { %1209 = vst [vmem:[%s1978_s16 + $0xe8] sm:$0xff] %v1199_v57 }
 0x543   : > { %v1172_v59 = vpop.f32.mrf.mxu0  ;;  %v1201_v60 = vpop.f32.mrf.mxu1 }
 0x544   : > { %v1173_v61 = vadd.f32 %v1172_v59, %v1126_v58  ;;  %v1202_v62 = vadd.f32 %v1201_v60, %v1126_v58 }
 0x546   : > { %1210 = vst [vmem:[%s1978_s16 + $0xf0] sm:$0xff] %v1173_v61 }
 0x547   : > { %1211 = vst [vmem:[%s1978_s16 + $0xf8] sm:$0xff] %v1202_v62 }
 0x548   : > { %1586 = shalt.err (!%p1583_p3)
}
 0x549   : > { %s1624_s14 = smov 256   ;;  %s1625_s16 = smov 16  }
 0x54a   : > { %1514 = dma.vmem_to_hbm [thread:$0]  (%p1694_p5), %s1226_s25, 4096, %s1228_s26, %s1213_s22, %s1624_s14, %s1624_s14, %s1625_s16  }
 0x54b PF: > { %p1520_p4 = scmp.ge.s32.totalorder %s1621_s21, 2  ;;  %s1242_s12 = sand.u32 1, %s1609_s18  }
 0x54c   : > { %s1243_s13 = scalar_lea.sflag [#allocation3], %s1242_s12 }
 0x54d   : > { %p1517_p7 = pnand %p1520_p4, %p1698_p6 }
 0x54f   : > { %p1518_p8 = pneg %p1517_p7 }
 0x551   : > { %1604 = dma.done.wait (%p1518_p8), %s1243_s13, 4096  }
 0x552   : > { %1606 = vsyncadd (%p1518_p8), %s1243_s13, 4294963200  ;;  %p15_p9 = scmp.ge.s32.totalorder %s1681_s24, 4   ;;  %s2454_s18 = smov %s1613_s19 }
 0x553   : > { %s2455_s19 = smov %s1617_s20  ;;  %s2456_s20 = smov %s1692_s27 }
 0x554   : > { %s2457_s21 = smov %s1681_s24  ;;  %17 = sbr.rel (!%p15_p9) target bundleno = 3 (0x3), region = 87 }
 0x559   :  { %1249 = vsyncpa [#allocation3], 1 }
 0x55a   :  { %1251 = vsyncpa [#allocation3 + $0x1], 1 }

</bundles_post_ra>
